<compile_context>
chip_gen: v7x
topology: tpu7x:2x2x1
jax: 0.10.0
libtpu: 0.0.40
codegen_flags: <defaults>
</compile_context>

<pallas_src>
import jax
import jax.numpy as jnp
from jax.experimental import pallas as pl
from jax.experimental.pallas import tpu as pltpu


def _round_up(x, m):
    return (x + m - 1) // m * m


def _vmem_info():
    """(physical VMEM bytes, per-kernel vmem_limit_bytes) with a safe fallback."""
    try:
        cap = int(pltpu.get_tpu_info().vmem_capacity_bytes)
    except Exception:
        cap = 64 * 1024 * 1024          # conservative: v7x per-core VMEM
    limit = min(cap * 3 // 4, 100 * 1024 * 1024)   # 48 MiB on v7x, 96 MiB on v5e/v6e
    return cap, limit


def _pick_tile(padded, cap):
    """Largest multiple-of-128 tile <= cap that evenly divides `padded`."""
    for t in range(min(cap, padded), 127, -128):
        if padded % t == 0:
            return t
    return padded


# ---------------------------------------------------------------------------
# Kernels
# ---------------------------------------------------------------------------
def _linear_kernel(x_ref, w_ref, o_ref):
    # One (TM x K) @ (K x TN) MXU matmul per grid step; f32 accumulation,
    # lane-dense store (n_pad is a 128 multiple).
    o_ref[...] = jnp.dot(
        x_ref[...], w_ref[...], preferred_element_type=jnp.float32
    ).astype(o_ref.dtype)


def _linear_ksplit_kernel(x_ref, w_ref, o_ref, acc_ref):
    # K-split variant: f32 VMEM accumulator, init/finalize under pl.when.
    @pl.when(pl.program_id(2) == 0)
    def _():
        acc_ref[...] = jnp.zeros_like(acc_ref)

    acc_ref[...] += jnp.dot(
        x_ref[...], w_ref[...], preferred_element_type=jnp.float32
    )

    @pl.when(pl.program_id(2) == pl.num_programs(2) - 1)
    def _():
        o_ref[...] = acc_ref[...].astype(o_ref.dtype)


# ---------------------------------------------------------------------------
# Wrappers
# ---------------------------------------------------------------------------
def prepare_weight(weight, mxu_dtype=jnp.bfloat16):
    """One-time packing of the PyTorch-layout weight [n_classes, latent_dim]:
    transpose to [latent_dim, n_classes], cast to the MXU dtype and zero-pad
    both dims to multiples of 128.  Do this at parameter init / load so the
    per-forward path never re-transposes or re-pads the weight."""
    n_classes, d = weight.shape
    k_pad = _round_up(d, 128)
    n_pad = _round_up(n_classes, 128)
    wt = weight.T.astype(mxu_dtype)
    if (k_pad, n_pad) != (d, n_classes):
        wt = jnp.pad(wt, ((0, k_pad - d), (0, n_pad - n_classes)))
    return wt


def linear_forward(x, w_packed, n_classes, *, out_dtype=jnp.float32):
    """Forward of nn.Linear(latent_dim, n_classes, bias=False): x @ W.T.

    x:        [..., latent_dim]  (any float dtype)
    w_packed: [k_pad, n_pad]     from prepare_weight (pre-transposed/padded)
    returns   [..., n_classes]   out_dtype (f32 default; bf16 is a v5e opt-in)

    NOTE: MXU operands are bf16 with f32 accumulation -- an explicit,
    documented deviation (~1e-2 rel err) from PyTorch's pure-f32 nn.Linear.
    """
    *lead, d = x.shape
    k_pad, n_pad = w_packed.shape
    assert k_pad == _round_up(d, 128), "w_packed latent_dim mismatch"
    assert n_pad >= n_classes

    x2 = x.reshape(-1, d)
    m = x2.shape[0]
    mxu_dtype = w_packed.dtype
    mxu_bytes = jnp.dtype(mxu_dtype).itemsize
    out_bytes_per = jnp.dtype(out_dtype).itemsize

    cap, vmem_limit = _vmem_info()
    tile_cap = 1024 if cap >= 100 * 1024 * 1024 else 512   # v5e/v6e vs v7x

    # Row tiling: bf16 packs 16 rows per vreg, so never go below 16; for
    # m >= 128 pad to a 128 multiple and pick a tile that divides it exactly
    # so padding waste is bounded by < 128 rows.
    if m < 128:
        tm = _round_up(max(m, 1), 16)
        m_pad = tm
    else:
        m_pad = _round_up(m, 128)
        tm = _pick_tile(m_pad, tile_cap)
    tn = _pick_tile(n_pad, tile_cap)

    # bf16 cast is required for the MXU path; padding only when needed
    # (common case d % 128 == 0 and aligned rows -> straight pass-through).
    xb = x2.astype(mxu_dtype)
    if (m_pad, k_pad) != (m, d):
        xb = jnp.pad(xb, ((0, m_pad - m), (0, k_pad - d)))

    gm, gn = m_pad // tm, n_pad // tn
    x_bytes = m_pad * k_pad * mxu_bytes
    w_bytes = k_pad * n_pad * mxu_bytes
    o_bytes = m_pad * n_pad * out_bytes_per

    # Split the contraction dim only when full-K tiles would crowd VMEM
    # (mainly v7x's 64 MiB); otherwise a 2-D grid with K resident is cheapest.
    def _tile_vmem(tk_):
        # double-buffered bf16 input tiles + f32 acc + double-buffered output
        return (2 * (tm * tk_ + tk_ * tn) * mxu_bytes
                + tm * tn * 4 + 2 * tm * tn * out_bytes_per)

    budget = int(vmem_limit * 0.7)
    tk, gk = k_pad, 1
    if _tile_vmem(k_pad) > budget:
        for cand in (2048, 1024, 512, 256, 128):
            if k_pad % cand == 0 and _tile_vmem(cand) <= budget:
                tk = cand
                break
        else:
            tk = 128
        gk = k_pad // tk

    if gk == 1:
        # 2-D grid.  Pick iteration order by re-fetch cost: the operand
        # indexed only by the outer axis is streamed once; the other is
        # re-fetched once per outer step.
        rows_outer = gm * w_bytes <= gn * x_bytes
        if rows_outer:
            grid = (gm, gn)
            x_spec = pl.BlockSpec((tm, k_pad), lambda i, j: (i, 0))
            w_spec = pl.BlockSpec((k_pad, tn), lambda i, j: (0, j))
            o_spec = pl.BlockSpec((tm, tn), lambda i, j: (i, j))
            refetch = gm * w_bytes + x_bytes
        else:
            grid = (gn, gm)
            x_spec = pl.BlockSpec((tm, k_pad), lambda j, i: (i, 0))
            w_spec = pl.BlockSpec((k_pad, tn), lambda j, i: (0, j))
            o_spec = pl.BlockSpec((tm, tn), lambda j, i: (i, j))
            refetch = gn * x_bytes + w_bytes
        kernel = _linear_kernel
        scratch = []
        semantics = ("parallel", "parallel")
    else:
        grid = (gm, gn, gk)
        x_spec = pl.BlockSpec((tm, tk), lambda i, j, k: (i, k))
        w_spec = pl.BlockSpec((tk, tn), lambda i, j, k: (k, j))
        o_spec = pl.BlockSpec((tm, tn), lambda i, j, k: (i, j))
        refetch = gn * x_bytes + gm * w_bytes
        kernel = _linear_ksplit_kernel
        scratch = [pltpu.VMEM((tm, tn), jnp.float32)]
        semantics = ("parallel", "parallel", "arbitrary")

    cost = pl.CostEstimate(flops=2 * m_pad * k_pad * n_pad,
                           transcendentals=0,
                           bytes_accessed=refetch + o_bytes)

    out = pl.pallas_call(
        kernel,
        out_shape=jax.ShapeDtypeStruct((m_pad, n_pad), out_dtype),
        grid_spec=pltpu.PrefetchScalarGridSpec(
            num_scalar_prefetch=0,
            grid=grid,
            in_specs=[x_spec, w_spec],
            out_specs=o_spec,
            scratch_shapes=scratch,
        ),
        compiler_params=pltpu.CompilerParams(
            dimension_semantics=semantics,
            vmem_limit_bytes=vmem_limit),
        cost_estimate=cost,
    )(xb, w_packed)

    out = out[:m, :n_classes]
    return out.reshape(*lead, n_classes)


if __name__ == "__main__":
    # Shapes implied by the module: x [batch, latent_dim], W [n_classes, latent_dim].
    B, LATENT_DIM, N_CLASSES = 2, 32, 10

    key = jax.random.PRNGKey(0)
    kx, kw = jax.random.split(key)
    x = jax.random.normal(kx, (B, LATENT_DIM), dtype=jnp.float32)
    weight = jax.random.normal(kw, (N_CLASSES, LATENT_DIM), dtype=jnp.float32) * 0.1

    # One-time parameter packing (hoisted out of the per-forward path).
    w_packed = jax.block_until_ready(prepare_weight(weight))

    fwd = jax.jit(linear_forward, static_argnums=(2,))
    out = jax.block_until_ready(fwd(x, w_packed, N_CLASSES))

    # Reference 1: same bf16-operand / f32-accumulate math (tight check).
    ref_bf16 = jnp.dot(x.astype(jnp.bfloat16), weight.T.astype(jnp.bfloat16),
                       preferred_element_type=jnp.float32)
    # Reference 2: pure f32 PyTorch semantics (loose check for bf16 rounding).
    ref_f32 = x @ weight.T

    assert out.shape == (B, N_CLASSES)
    assert jnp.allclose(out, ref_bf16, atol=1e-3, rtol=1e-3), "mismatch vs bf16 ref"
    assert jnp.allclose(out, ref_f32, atol=3e-2, rtol=3e-2), "mismatch vs f32 ref"
    print("KERNEL_OK")
</pallas_src>

<mosaic_0001>
module attributes {stable_mosaic.version = 11 : i64} {
  func.func @_linear_kernel(%arg0: i32, %arg1: i32, %arg2: memref<16x128xbf16, #tpu.memory_space<vmem>>, %arg3: memref<128x128xbf16, #tpu.memory_space<vmem>>, %arg4: memref<16x128xf32, #tpu.memory_space<vmem>>) attributes {dimension_semantics = [#tpu.dimension_semantics<parallel>, #tpu.dimension_semantics<parallel>], iteration_bounds = array<i64: 1, 1>, scalar_prefetch = 0 : i64, scratch_operands = 0 : i64, tpu.core_type = #tpu.core_type<tc>, window_params = [{transform_indices = @transform_0, window_bounds = array<i64: 16, 128>}, {transform_indices = @transform_1, window_bounds = array<i64: 128, 128>}, {transform_indices = @transform_2, window_bounds = array<i64: 16, 128>}]} {
    %c0 = arith.constant 0 : index
    %c0_0 = arith.constant 0 : index
    %0 = vector.load %arg2[%c0, %c0_0] : memref<16x128xbf16, #tpu.memory_space<vmem>>, vector<16x128xbf16>
    %c0_1 = arith.constant 0 : index
    %c0_2 = arith.constant 0 : index
    %1 = vector.load %arg3[%c0_1, %c0_2] : memref<128x128xbf16, #tpu.memory_space<vmem>>, vector<128x128xbf16>
    %cst = arith.constant dense<0.000000e+00> : vector<16x128xf32>
    %2 = tpu.matmul %0, %1, %cst {dimension_numbers = #tpu.dot_dimension_numbers<[1], [0], [0], [1], [0, 0, 1, 1], [], []>} : vector<16x128xbf16>, vector<128x128xbf16>, vector<16x128xf32> -> vector<16x128xf32>
    %c0_3 = arith.constant 0 : index
    %c0_4 = arith.constant 0 : index
    %3 = vector.load %arg4[%c0_3, %c0_4] : memref<16x128xf32, #tpu.memory_space<vmem>>, vector<16x128xf32>
    tpu.vector_store %arg4[%c0_3, %c0_4], %2 {strides = array<i32>} : memref<16x128xf32, #tpu.memory_space<vmem>>, vector<16x128xf32>,
    return
  }
  func.func @transform_0(%arg0: i32, %arg1: i32) -> (i32, i32) {
    %c0_i32 = arith.constant 0 : i32
    %c0_i32_0 = arith.constant 0 : i32
    return %arg1, %c0_i32 : i32, i32
  }
  func.func @transform_1(%arg0: i32, %arg1: i32) -> (i32, i32) {
    %c0_i32 = arith.constant 0 : i32
    %c0_i32_0 = arith.constant 0 : i32
    return %c0_i32, %arg0 : i32, i32
  }
  func.func @transform_2(%arg0: i32, %arg1: i32) -> (i32, i32) {
    %c0_i32 = arith.constant 0 : i32
    return %arg1, %arg0 : i32, i32
  }
}

</mosaic_0001>

<bundles_post_ra>
// kernel: linear_forward.1
= control target key start
LH: loop header
LB: loop body
LE: loop exit
PB: predicated region body
PF: predicated region fallthrough
CT: control target
= control target key end

     0   :  { %7 = vsyncpa [#allocation3], 0  ;;  %s222_s9 = smov [#allocation2]   ;;  %s263_s0 = inlined_call_operand.vmem [shape: bf16[16,128], index: 0, kind: input, shape index: {}]   ;;  %s264_s1 = inlined_call_operand.hbm [shape: bf16[128,128], index: 1, kind: input, shape index: {}]   ;;  %s265_s2 = inlined_call_operand.vmem [shape: f32[16,128], index: 2, kind: output, shape index: {}]  }
   0x1   :  { %s15_s10 = sshll.u32 %s222_s9, 4  ;;  %s198_s13 = scalar_lea.hbm %s264_s1, 1024  ;;  %s16_s10 = int_to_ptr.vmem [resolvable:$true] %s15_s10 }
   0x2   :  { %p199_p0 = scmp.ne.s32.totalorder %s264_s1, %s198_s13  ;;  %p202_p1 = scmp.lt.u32.totalorder %s198_s13, %s264_s1 }
   0x4   :  { %p204_p2 = pnand %p202_p1, %p199_p0 }
   0x6   :  { %207 = shalt.err (!%p204_p2)
}
   0x7   :  { %s208_s18 = scalar_lea.vmem %s16_s10, 1024  ;;  %p213_p4 = scmp.lt.s32.totalorder %s16_s10, %s16_s10 }
   0x8   :  { %p209_p3 = scmp.ne.s32.totalorder %s16_s10, %s208_s18  ;;  %p214_p5 = scmp.lt.s32.totalorder %s208_s18, %s208_s18 }
   0xa   :  { %p215_p6 = por %p214_p5, %p213_p4 }
   0xc   :  { %p216_p7 = pnand %p215_p6, %p209_p3 }
   0xe   :  { %219 = shalt.err (!%p216_p7)
}
   0xf   :  { %s223_s19 = smov 64   ;;  %s224_s20 = smov 4  }
  0x10   :  { %21 = dma.hbm_to_vmem [thread:$0]  %s264_s1, 1024, %s16_s10, [#allocation3], %s223_s19, %s223_s19, %s224_s20  }
  0x11   :  { %220 = dma.done.wait [#allocation3], 1024  }
  0x12   :  { %221 = vsyncadd [#allocation3], 4294966272  ;;  %v225_v0 = vmov 0.0   ;;  %vm226_vm0 = vmmov 0   ;;  %v189_v1 = vld [vmem:[#allocation2] sm:$0xff]   ;;  %v190_v2 = vld [vmem:[#allocation2 + $0x8] sm:$0xff]  }
  0x13   :  { %164 = vmatprep.subr.bf16.mxu0 %v225_v0  ;;  %180 = vmatprep.mubr.msk.bf16.mxu0 %vm226_vm0, %v225_v0  ;;  %v191_v3 = vld [vmem:[#allocation2 + $0x10] sm:$0xff]   ;;  %v192_v4 = vld [vmem:[#allocation2 + $0x18] sm:$0xff]   ;;  %v193_v5 = vld [vmem:[#allocation2 + $0x20] sm:$0xff]  }
  0x14   :  { %165 = vmatpush3.bf16.msra.mxu0 %v189_v1  ;;  %v194_v6 = vld [vmem:[#allocation2 + $0x28] sm:$0xff]   ;;  %v195_v7 = vld [vmem:[#allocation2 + $0x30] sm:$0xff]   ;;  %v196_v8 = vld [vmem:[#allocation2 + $0x38] sm:$0xff]  }
  0x15   :  { %166 = vmatprep.subr.bf16.mxu0 %v225_v0  ;;  %v197_v9 = vld [vmem:[%s263_s0] sm:$0xff]  }
  0x18   :  { %167 = vmatpush3.bf16.msra.mxu0 %v190_v2 }
  0x19   :  { %168 = vmatprep.subr.bf16.mxu0 %v225_v0 }
  0x1c   :  { %169 = vmatpush3.bf16.msra.mxu0 %v191_v3 }
  0x1d   :  { %170 = vmatprep.subr.bf16.mxu0 %v225_v0 }
  0x20   :  { %171 = vmatpush3.bf16.msra.mxu0 %v192_v4 }
  0x21   :  { %172 = vmatprep.subr.bf16.mxu0 %v225_v0 }
  0x24   :  { %173 = vmatpush3.bf16.msra.mxu0 %v193_v5 }
  0x25   :  { %174 = vmatprep.subr.bf16.mxu0 %v225_v0 }
  0x28   :  { %175 = vmatpush3.bf16.msra.mxu0 %v194_v6 }
  0x29   :  { %176 = vmatprep.subr.bf16.mxu0 %v225_v0 }
  0x2c   :  { %177 = vmatpush3.bf16.msra.mxu0 %v195_v7 }
  0x2d   :  { %178 = vmatprep.subr.bf16.mxu0 %v225_v0 }
  0x30   :  { %179 = vmatpush3.bf16.msra.mxu0 %v196_v8 }
  0x33   :  { %181 = vmatmul.mubr.bf16.vlgmr.msra.gmra.mrb[0].mxu0 %v197_v9 }
 0x106   :  { %v132_v10 = vpop.f32.mrb[0].mxu0 }
 0x107   :  { %139 = vst [vmem:[%s265_s2] sm:$0xff] %v132_v10  ;;  %v182_v11 = vpop.f32.mrb[1].mxu0 }
 0x108   :  { %v135_v12 = vpop.f32.mrb[2].mxu0 }
 0x109   :  { %140 = vst [vmem:[%s265_s2 + $0x8] sm:$0xff] %v135_v12  ;;  %v183_v13 = vpop.f32.mrb[3].mxu0 }
 0x10a   :  { %145 = vsyncpa [#allocation3], 1 }

</bundles_post_ra>
